<compile_context>
chip_gen: v5e
topology: v5e:2x2
jax: 0.10.0
libtpu: 0.0.40
codegen_flags: <defaults>
</compile_context>

<pallas_src>
import math
from functools import partial

import jax
import jax.numpy as jnp
from jax import lax
from jax.experimental import pallas as pl
from jax.experimental.pallas import tpu as pltpu


def _feature_attention_kernel(x3_ref, xflat_ref, w1rep_ref, w2blk_ref, brep_ref,
                              asel_ref, mb_ref, o_ref, *, alpha):
    # x3: (TB, K, W); xflat: (TB, K*W); w1rep: (W, K*E) lane-tiled; w2blk: (K*W, K*E) block-diag;
    # brep: (1, K*E); asel: (K*E, K) block-diag columns of a; mb (fused mask+bias): (K, K)
    TB, K, W = x3_ref.shape
    KE = w1rep_ref.shape[1]                                   # K * E

    x3 = x3_ref[...]                                          # (TB, K, W)
    x2 = x3.reshape(TB * K, W)                                # leading-dim merge (layout preserving)

    # p_rep[b*K+i, j*E+e] = (x_i @ W1^T + b)[e]   (lane-tiled weight -> lane-dense, no relayout)
    p_rep = jnp.dot(x2, w1rep_ref[...],
                    preferred_element_type=jnp.float32) + brep_ref[...]          # (TB*K, K*E)
    # q_flat[b, j*E+e]   = (x_j @ W2^T)[e]        (block-diagonal weight -> lane-dense, rows = b)
    q_flat = jnp.dot(xflat_ref[...], w2blk_ref[...],
                     preferred_element_type=jnp.float32)                          # (TB, K*E)

    # All (i, j) pairs on dense lanes: t[b, i, j*E+e] = p[b,i,e] + q[b,j,e]
    t = p_rep.reshape(TB, K, KE) + q_flat[:, None, :]          # (TB, K, K*E)
    t = jnp.maximum(t, alpha * t)                              # LeakyReLU(alpha) as a single vmax

    # contract with `a` + segmented reduce over each E chunk, fused into one MXU matmul
    e = jnp.dot(t.reshape(TB * K, KE), asel_ref[...],
                preferred_element_type=jnp.float32)            # (TB*K, K)
    e = e.reshape(TB, K, K) + mb_ref[...]                      # fused adjacency mask + bias

    # softmax over j (dim=2 in the PyTorch code)
    m = jnp.max(e, axis=-1, keepdims=True)
    ex = jnp.exp(e - m)
    attn = ex * pl.reciprocal(jnp.sum(ex, axis=-1, keepdims=True), approx=True)   # (TB, K, K)
    # TODO(synk): dropout on `attn` is identity here (eval semantics / dropout=0.0).

    # h[b,i,w] = sum_j attn[b,i,j] * x[b,j,w]   (single batched MXU dot_general)
    h = lax.dot_general(attn, x3, (((2,), (1,)), ((0,), (0,))),
                        preferred_element_type=jnp.float32)    # (TB, K, W)
    o_ref[...] = jax.nn.sigmoid(h).astype(o_ref.dtype)


def feature_attention_forward(x, params, *, alpha, gumbel_key, tb=None):
    """x: (B, W, K) as in the PyTorch forward input.  Returns (B, W, K)."""
    B, W, K = x.shape

    # ---- learned-graph adjacency (small K x K, plain-JAX glue) --------------------------------
    emb = params["embedding"].astype(jnp.float32)         # (K, E)
    rn = jnp.linalg.norm(emb, axis=-1)                    # (K,)
    cos = emb @ emb.T                                     # (K, K)
    normed = rn[:, None] * rn[None, :]
    lg = cos / normed
    lg = lg / normed                     # NOTE: divided twice, exactly as in the PyTorch code
    lg = (lg + 1.0) / 2.0
    stacked = jnp.stack([lg, 1.0 - lg], axis=-1)          # (K, K, 2)
    # gumbel_softmax(tau=1, hard=True): forward value is one-hot argmax of (logits + gumbel)
    g = jax.random.gumbel(gumbel_key, stacked.shape, dtype=jnp.float32)
    adj = (jnp.argmax(stacked + g, axis=-1) == 0).astype(jnp.float32)    # channel [:, :, 0]
    adj = adj * (1.0 - jnp.eye(K, dtype=jnp.float32))                    # zero the diagonal

    # fused additive mask + bias:  where(adj==1, e, -1e12) + bias  ==  e + (adj-1)*1e12 + bias
    mask_bias = params["bias"].astype(jnp.float32) + (adj - 1.0) * 1.0e12    # (K, K)

    # ---- split Linear(2W -> E) and pre-pack weights into lane-dense forms ---------------------
    lin_w = params["lin_w"].astype(jnp.float32)            # (E, 2W)
    E = lin_w.shape[0]
    KE = K * E
    w1t = jnp.transpose(lin_w[:, :W])                       # (W, E)
    w2t = jnp.transpose(lin_w[:, W:])                       # (W, E)
    blin = params["lin_b"].astype(jnp.float32).reshape(1, E)
    a_col = params["a"].astype(jnp.float32).reshape(E, 1)

    eye_k = jnp.eye(K, dtype=jnp.float32)
    w1rep = jnp.tile(w1t, (1, K))                           # (W, K*E): p replicated over j lanes
    brep = jnp.tile(blin, (1, K))                           # (1, K*E)
    w2blk = jnp.kron(eye_k, w2t)                            # (K*W, K*E): block-diag -> q lane-flat
    asel = jnp.kron(eye_k, a_col)                           # (K*E, K): segmented reduce with a

    # ---- generation-aware VMEM limit & VMEM-budget-driven TB sizing ---------------------------
    vmem_cap = 64 * 1024 * 1024                             # safe fallback (v7x per-TC capacity)
    try:
        vmem_cap = int(pltpu.get_tpu_info().vmem_capacity_bytes)
    except Exception:
        pass
    vmem_limit = max(32 * 1024 * 1024, (vmem_cap * 3) // 4)  # ~96 MiB v5e/v6e, ~48 MiB v7x

    if tb is None:
        # ~4 live f32 copies of the (TB, K, K*E) pairwise tensor + double-buffered x/out tiles.
        bytes_per_tb = 4 * (4 * K * K * E + 8 * K * W + 4 * K * K)
        weight_bytes = 4 * (W * KE + (K * W) * KE + KE + KE * K + K * K + 2 * KE)
        usable = vmem_limit - 2 * weight_bytes - (4 << 20)   # headroom for compiler scratch
        tb = max(1, usable // max(bytes_per_tb, 1))
        tb = int(min(B, tb, 512))
        # Keep a 2-step split only when each half still yields >= 256 MXU rows (megacore on v7x,
        # negligible extra step overhead on single-TC v5e/v6e).  Otherwise: one big tile.
        if B * K >= 2 * 256:
            tb = min(tb, pl.cdiv(B, 2))
    tb = int(tb)
    if tb >= B:
        tb = B
    elif tb % 8 != 0:
        tb = max(8, (tb // 8) * 8)    # multi-step: keep block second-minor dim sublane-aligned

    grid_b = pl.cdiv(B, tb)
    Bp = grid_b * tb

    x_kw = jnp.transpose(x, (0, 2, 1)).astype(jnp.float32)   # (B, K, W)
    if Bp != B:
        x_kw = jnp.pad(x_kw, ((0, Bp - B), (0, 0), (0, 0)))
    x_flat = x_kw.reshape(Bp, K * W)                          # lane-dense copy for the q matmul

    out = pl.pallas_call(
        partial(_feature_attention_kernel, alpha=alpha),
        out_shape=jax.ShapeDtypeStruct((Bp, K, W), jnp.float32),
        grid_spec=pltpu.PrefetchScalarGridSpec(
            num_scalar_prefetch=0,
            grid=(grid_b,),
            in_specs=[
                pl.BlockSpec((tb, K, W), lambda b: (b, 0, 0)),    # x tile (3-D, for p & attn@x)
                pl.BlockSpec((tb, K * W), lambda b: (b, 0)),      # x tile (lane-flat, for q)
                pl.BlockSpec((W, KE), lambda b: (0, 0)),          # tile(W1^T, K)
                pl.BlockSpec((K * W, KE), lambda b: (0, 0)),      # blockdiag(W2^T)
                pl.BlockSpec((1, KE), lambda b: (0, 0)),          # tiled lin bias
                pl.BlockSpec((KE, K), lambda b: (0, 0)),          # blockdiag(a) selector
                pl.BlockSpec((K, K), lambda b: (0, 0)),           # fused adjacency mask + bias
            ],
            out_specs=pl.BlockSpec((tb, K, W), lambda b: (b, 0, 0)),
        ),
        compiler_params=pltpu.CompilerParams(
            dimension_semantics=("parallel",),
            vmem_limit_bytes=int(vmem_limit),
        ),
    )(x_kw, x_flat, w1rep, w2blk, brep, asel, mask_bias)

    if Bp != B:
        out = out[:B]
    return jnp.transpose(out, (0, 2, 1))                      # back to (B, W, K)


def init_params(key, n_features, window_size, embed_dim):
    """Deterministic synthetic init matching the module's parameter shapes (use_gatv2=True)."""
    E = 2 * embed_dim                       # gatv2 doubles embed_dim
    lin_in = 2 * window_size
    k1, k2, k3, k4 = jax.random.split(key, 4)
    bound = 1.0 / math.sqrt(lin_in)
    lin_w = jax.random.uniform(k1, (E, lin_in), minval=-bound, maxval=bound, dtype=jnp.float32)
    lin_b = jax.random.uniform(k2, (E,), minval=-bound, maxval=bound, dtype=jnp.float32)
    a_bound = 1.414 * math.sqrt(6.0 / (E + 1))                           # xavier_uniform, gain=1.414
    a = jax.random.uniform(k3, (E, 1), minval=-a_bound, maxval=a_bound, dtype=jnp.float32)
    embedding = jax.random.normal(k4, (n_features, E), dtype=jnp.float32)
    bias = jnp.zeros((n_features, n_features), dtype=jnp.float32)
    return dict(lin_w=lin_w, lin_b=lin_b, a=a, embedding=embedding, bias=bias)


if __name__ == "__main__":
    key = jax.random.PRNGKey(0)
    k_params, k_x, k_gumbel = jax.random.split(key, 3)

    B, window_size, n_features, embed_dim = 2, 16, 8, 16
    alpha = 0.2                              # LeakyReLU negative slope
    # dropout = 0.0 (eval semantics -> identity), see TODO in kernel

    params = init_params(k_params, n_features, window_size, embed_dim)
    x = jax.random.normal(k_x, (B, window_size, n_features), dtype=jnp.float32)

    out = feature_attention_forward(x, params, alpha=alpha, gumbel_key=k_gumbel)
    out = jax.block_until_ready(out)
    assert out.shape == (B, window_size, n_features)
    assert bool(jnp.all(jnp.isfinite(out)))
    print("KERNEL_OK")
</pallas_src>

<mosaic_0001>
module attributes {stable_mosaic.version = 11 : i64} {
  func.func @_feature_attention_kernel(%arg0: i32, %arg1: memref<2x8x16xf32, #tpu.memory_space<vmem>>, %arg2: memref<2x128xf32, #tpu.memory_space<vmem>>, %arg3: memref<16x256xf32, #tpu.memory_space<vmem>>, %arg4: memref<128x256xf32, #tpu.memory_space<vmem>>, %arg5: memref<1x256xf32, #tpu.memory_space<vmem>>, %arg6: memref<256x8xf32, #tpu.memory_space<vmem>>, %arg7: memref<8x8xf32, #tpu.memory_space<vmem>>, %arg8: memref<2x8x16xf32, #tpu.memory_space<vmem>>) attributes {dimension_semantics = [#tpu.dimension_semantics<parallel>], iteration_bounds = array<i64: 1>, scalar_prefetch = 0 : i64, scratch_operands = 0 : i64, tpu.core_type = #tpu.core_type<tc>, window_params = [{transform_indices = @transform_0, window_bounds = array<i64: 2, 8, 16>}, {transform_indices = @transform_1, window_bounds = array<i64: 2, 128>}, {pipeline_mode = #tpu.pipeline_mode<synchronous>, transform_indices = @transform_2, window_bounds = array<i64: 16, 256>}, {pipeline_mode = #tpu.pipeline_mode<synchronous>, transform_indices = @transform_3, window_bounds = array<i64: 128, 256>}, {pipeline_mode = #tpu.pipeline_mode<synchronous>, transform_indices = @transform_4, window_bounds = array<i64: 1, 256>}, {pipeline_mode = #tpu.pipeline_mode<synchronous>, transform_indices = @transform_5, window_bounds = array<i64: 256, 8>}, {pipeline_mode = #tpu.pipeline_mode<synchronous>, transform_indices = @transform_6, window_bounds = array<i64: 8, 8>}, {transform_indices = @transform_7, window_bounds = array<i64: 2, 8, 16>}]} {
    %c0 = arith.constant 0 : index
    %c0_0 = arith.constant 0 : index
    %c0_1 = arith.constant 0 : index
    %0 = vector.load %arg1[%c0, %c0_0, %c0_1] : memref<2x8x16xf32, #tpu.memory_space<vmem>>, vector<2x8x16xf32>
    %1 = vector.shape_cast %0 : vector<2x8x16xf32> to vector<16x16xf32>
    %c0_2 = arith.constant 0 : index
    %c0_3 = arith.constant 0 : index
    %2 = vector.load %arg3[%c0_2, %c0_3] : memref<16x256xf32, #tpu.memory_space<vmem>>, vector<16x256xf32>
    %cst = arith.constant dense<0.000000e+00> : vector<16x256xf32>
    %3 = tpu.matmul %1, %2, %cst {dimension_numbers = #tpu.dot_dimension_numbers<[1], [0], [0], [1], [0, 0, 1, 1], [], []>} : vector<16x16xf32>, vector<16x256xf32>, vector<16x256xf32> -> vector<16x256xf32>
    %c0_4 = arith.constant 0 : index
    %c0_5 = arith.constant 0 : index
    %4 = vector.load %arg5[%c0_4, %c0_5] : memref<1x256xf32, #tpu.memory_space<vmem>>, vector<1x256xf32>
    %5 = vector.broadcast %4 : vector<1x256xf32> to vector<16x256xf32>
    %6 = arith.addf %3, %5 : vector<16x256xf32>
    %c0_6 = arith.constant 0 : index
    %c0_7 = arith.constant 0 : index
    %7 = vector.load %arg2[%c0_6, %c0_7] : memref<2x128xf32, #tpu.memory_space<vmem>>, vector<2x128xf32>
    %c0_8 = arith.constant 0 : index
    %c0_9 = arith.constant 0 : index
    %8 = vector.load %arg4[%c0_8, %c0_9] : memref<128x256xf32, #tpu.memory_space<vmem>>, vector<128x256xf32>
    %cst_10 = arith.constant dense<0.000000e+00> : vector<2x256xf32>
    %9 = tpu.matmul %7, %8, %cst_10 {dimension_numbers = #tpu.dot_dimension_numbers<[1], [0], [0], [1], [0, 0, 1, 1], [], []>} : vector<2x128xf32>, vector<128x256xf32>, vector<2x256xf32> -> vector<2x256xf32>
    %10 = vector.shape_cast %6 : vector<16x256xf32> to vector<2x8x256xf32>
    %11 = vector.shape_cast %9 : vector<2x256xf32> to vector<2x1x256xf32>
    %12 = vector.broadcast %11 : vector<2x1x256xf32> to vector<2x8x256xf32>
    %13 = arith.addf %10, %12 : vector<2x8x256xf32>
    %cst_11 = arith.constant 2.000000e-01 : f32
    %14 = vector.broadcast %cst_11 : f32 to vector<2x8x256xf32>
    %15 = arith.mulf %14, %13 : vector<2x8x256xf32>
    %16 = arith.maximumf %13, %15 : vector<2x8x256xf32>
    %17 = vector.shape_cast %16 : vector<2x8x256xf32> to vector<16x256xf32>
    %c0_12 = arith.constant 0 : index
    %c0_13 = arith.constant 0 : index
    %18 = vector.load %arg6[%c0_12, %c0_13] : memref<256x8xf32, #tpu.memory_space<vmem>>, vector<256x8xf32>
    %cst_14 = arith.constant dense<0.000000e+00> : vector<16x8xf32>
    %19 = tpu.matmul %17, %18, %cst_14 {dimension_numbers = #tpu.dot_dimension_numbers<[1], [0], [0], [1], [0, 0, 1, 1], [], []>} : vector<16x256xf32>, vector<256x8xf32>, vector<16x8xf32> -> vector<16x8xf32>
    %20 = vector.shape_cast %19 : vector<16x8xf32> to vector<2x8x8xf32>
    %c0_15 = arith.constant 0 : index
    %c0_16 = arith.constant 0 : index
    %21 = vector.load %arg7[%c0_15, %c0_16] : memref<8x8xf32, #tpu.memory_space<vmem>>, vector<8x8xf32>
    %22 = vector.shape_cast %21 : vector<8x8xf32> to vector<1x8x8xf32>
    %23 = vector.broadcast %22 : vector<1x8x8xf32> to vector<2x8x8xf32>
    %24 = arith.addf %20, %23 : vector<2x8x8xf32>
    %cst_17 = arith.constant dense<0xFF800000> : vector<2x8xf32>
    %25 = vector.multi_reduction <maximumf>, %24, %cst_17 [2] : vector<2x8x8xf32> to vector<2x8xf32>
    %26 = vector.shape_cast %25 : vector<2x8xf32> to vector<2x8x1xf32>
    %27 = vector.broadcast %26 : vector<2x8x1xf32> to vector<2x8x8xf32>
    %28 = arith.subf %24, %27 : vector<2x8x8xf32>
    %29 = math.exp %28 : vector<2x8x8xf32>
    %cst_18 = arith.constant dense<0.000000e+00> : vector<2x8xf32>
    %30 = vector.multi_reduction <add>, %29, %cst_18 [2] : vector<2x8x8xf32> to vector<2x8xf32>
    %31 = vector.shape_cast %30 : vector<2x8xf32> to vector<2x8x1xf32>
    %32 = tpu.reciprocal %31 {approx = true} : vector<2x8x1xf32> -> vector<2x8x1xf32>
    %33 = vector.broadcast %32 : vector<2x8x1xf32> to vector<2x8x8xf32>
    %34 = arith.mulf %29, %33 : vector<2x8x8xf32>
    %cst_19 = arith.constant dense<0.000000e+00> : vector<2x8x16xf32>
    %35 = tpu.matmul %34, %0, %cst_19 {dimension_numbers = #tpu.dot_dimension_numbers<[2], [1], [1], [2], [0, 0, 0, 1, 1, 2], [0], [0]>} : vector<2x8x8xf32>, vector<2x8x16xf32>, vector<2x8x16xf32> -> vector<2x8x16xf32>
    %36 = arith.negf %35 : vector<2x8x16xf32>
    %37 = math.exp %36 : vector<2x8x16xf32>
    %cst_20 = arith.constant 1.000000e+00 : f32
    %38 = vector.broadcast %cst_20 : f32 to vector<2x8x16xf32>
    %39 = arith.addf %38, %37 : vector<2x8x16xf32>
    %40 = arith.divf %38, %39 : vector<2x8x16xf32>
    %c0_21 = arith.constant 0 : index
    %c0_22 = arith.constant 0 : index
    %c0_23 = arith.constant 0 : index
    %41 = vector.load %arg8[%c0_21, %c0_22, %c0_23] : memref<2x8x16xf32, #tpu.memory_space<vmem>>, vector<2x8x16xf32>
    tpu.vector_store %arg8[%c0_21, %c0_22, %c0_23], %40 {strides = array<i32>} : memref<2x8x16xf32, #tpu.memory_space<vmem>>, vector<2x8x16xf32>,
    return
  }
  func.func @transform_0(%arg0: i32) -> (i32, i32, i32) {
    %c0_i32 = arith.constant 0 : i32
    %c0_i32_0 = arith.constant 0 : i32
    %c0_i32_1 = arith.constant 0 : i32
    return %arg0, %c0_i32, %c0_i32_0 : i32, i32, i32
  }
  func.func @transform_1(%arg0: i32) -> (i32, i32) {
    %c0_i32 = arith.constant 0 : i32
    %c0_i32_0 = arith.constant 0 : i32
    return %arg0, %c0_i32 : i32, i32
  }
  func.func @transform_2(%arg0: i32) -> (i32, i32) {
    %c0_i32 = arith.constant 0 : i32
    %c0_i32_0 = arith.constant 0 : i32
    %c0_i32_1 = arith.constant 0 : i32
    return %c0_i32, %c0_i32_0 : i32, i32
  }
  func.func @transform_3(%arg0: i32) -> (i32, i32) {
    %c0_i32 = arith.constant 0 : i32
    %c0_i32_0 = arith.constant 0 : i32
    %c0_i32_1 = arith.constant 0 : i32
    return %c0_i32, %c0_i32_0 : i32, i32
  }
  func.func @transform_4(%arg0: i32) -> (i32, i32) {
    %c0_i32 = arith.constant 0 : i32
    %c0_i32_0 = arith.constant 0 : i32
    %c0_i32_1 = arith.constant 0 : i32
    return %c0_i32, %c0_i32_0 : i32, i32
  }
  func.func @transform_5(%arg0: i32) -> (i32, i32) {
    %c0_i32 = arith.constant 0 : i32
    %c0_i32_0 = arith.constant 0 : i32
    %c0_i32_1 = arith.constant 0 : i32
    return %c0_i32, %c0_i32_0 : i32, i32
  }
  func.func @transform_6(%arg0: i32) -> (i32, i32) {
    %c0_i32 = arith.constant 0 : i32
    %c0_i32_0 = arith.constant 0 : i32
    %c0_i32_1 = arith.constant 0 : i32
    return %c0_i32, %c0_i32_0 : i32, i32
  }
  func.func @transform_7(%arg0: i32) -> (i32, i32, i32) {
    %c0_i32 = arith.constant 0 : i32
    %c0_i32_0 = arith.constant 0 : i32
    %c0_i32_1 = arith.constant 0 : i32
    return %arg0, %c0_i32, %c0_i32_0 : i32, i32, i32
  }
}

</mosaic_0001>

<bundles_post_ra>
// kernel: tpu_custom_call.1
= control target key start
LH: loop header
LB: loop body
LE: loop exit
PB: predicated region body
PF: predicated region fallthrough
CT: control target
= control target key end

     0   :  { %12 = vsyncpa [#allocation3], 0  ;;  %s858_s0 = inlined_call_operand.vmem [shape: f32[2,8,16], index: 0, kind: input, shape index: {}]   ;;  %s859_s1 = inlined_call_operand.vmem [shape: f32[2,128], index: 1, kind: input, shape index: {}]   ;;  %s860_s2 = inlined_call_operand.hbm [shape: f32[16,256], index: 2, kind: input, shape index: {}]   ;;  %s861_s3 = inlined_call_operand.vmem [shape: f32[128,256], index: 3, kind: input, shape index: {}]   ;;  %s862_s4 = inlined_call_operand.hbm [shape: f32[1,256], index: 4, kind: input, shape index: {}]   ;;  %s863_s5 = inlined_call_operand.vmem [shape: f32[256,8], index: 5, kind: input, shape index: {}]   ;;  %s864_s6 = inlined_call_operand.hbm [shape: f32[8,8], index: 6, kind: input, shape index: {}]   ;;  %s865_s7 = inlined_call_operand.hbm [shape: f32[2,8,16], index: 7, kind: output, shape index: {}]  }
   0x1   :  { %13 = vsyncpa [#allocation6], 0  ;;  %s39_s26 = sshll.u32 %s862_s4, 4  ;;  %s40_s26 = int_to_ptr.hbm [resolvable:$true] %s39_s26 }
   0x2   :  { %14 = vsyncpa [#allocation4], 0  ;;  %s580_s27 = smov [#allocation5]   ;;  %s23_s8 = sshll.u32 %s860_s2, 4  ;;  %s24_s8 = int_to_ptr.hbm [resolvable:$true] %s23_s8 }
   0x3   :  { %s41_s28 = sshll.u32 %s580_s27, 4  ;;  %s581_s9 = smov [#allocation2]   ;;  %s42_s28 = int_to_ptr.vmem [resolvable:$true] %s41_s28 }
   0x4   :  { %44 = dma.hbm_to_vmem [thread:$0]  %s40_s26, 32, %s42_s28, [#allocation6]  }
   0x5   :  { %s25_s10 = sshll.u32 %s581_s9, 4  ;;  %s582_s11 = smov 256   ;;  %s26_s10 = int_to_ptr.vmem [resolvable:$true] %s25_s10 }
   0x6   :  { %s583_s12 = smov 16   ;;  %s52_s4 = sshll.u32 %s864_s6, 4  ;;  %s53_s4 = int_to_ptr.hbm [resolvable:$true] %s52_s4 }
   0x7   :  { %31 = dma.hbm_to_vmem [thread:$0]  %s24_s8, 512, %s26_s10, [#allocation3], %s582_s11, %s582_s11, %s583_s12  }
   0x8   :  { %s584_s15 = smov [#allocation7]  }
   0x9   :  { %s54_s16 = sshll.u32 %s584_s15, 4  ;;  %s55_s16 = int_to_ptr.vmem [resolvable:$true] %s54_s16 }
   0xa   :  { %57 = dma.hbm_to_vmem [thread:$0]  %s53_s4, 128, %s55_s16, [#allocation6]  }
   0xb   :  { %574 = dma.done.wait [#allocation3], 512  }
   0xc   :  { %575 = vsyncadd [#allocation3], 4294966784 }
   0xd   :  { %576 = dma.done.wait [#allocation6], 160  }
   0xe   :  { %577 = vsyncadd [#allocation6], 4294967136  ;;  %v167_v0 = vld [vmem:[%s861_s3 + $0xf8] sm:$0xff]  ;;  %v166_v1 = vld [vmem:[%s861_s3 + $0xf0] sm:$0xff]  ;;  %vm82_vm0 = vcmask 130048   ;;  %vm211_vm1 = vcmask 1040384  }
   0xf   :  { %v165_v2 = vld [vmem:[%s861_s3 + $0xe8] sm:$0xff]  ;;  %188 = vmatpush.msra.mxu3 %v167_v0  ;;  %168 = vmatpush.msra.mxu2 %v166_v1  ;;  %v164_v3 = vld [vmem:[%s861_s3 + $0xe0] sm:$0xff]  ;;  %v163_v4 = vld [vmem:[%s861_s3 + $0xd8] sm:$0xff]  ;;  %vm213_vm2 = vcmask 1041409   ;;  %vm317_vm3 = vcmask 64512   ;;  %s432_s2 = sshll.u32 %s865_s7, 4  ;;  %s433_s2 = int_to_ptr.hbm [resolvable:$true] %s432_s2 }
  0x10   :  { %v162_v5 = vld [vmem:[%s861_s3 + $0xd0] sm:$0xff]  ;;  %v161_v6 = vld [vmem:[%s861_s3 + $0xc8] sm:$0xff]  ;;  %v160_v7 = vld [vmem:[%s861_s3 + $0xc0] sm:$0xff]  ;;  %s586_s17 = smov 128   ;;  %s587_s18 = smov 8  }
  0x11   :  { %189 = vmatpush.msra.mxu3 %v165_v2  ;;  %169 = vmatpush.msra.mxu2 %v164_v3  ;;  %v159_v8 = vld [vmem:[%s861_s3 + $0xb8] sm:$0xff]  ;;  %v158_v9 = vld [vmem:[%s861_s3 + $0xb0] sm:$0xff]  ;;  %v157_v10 = vld [vmem:[%s861_s3 + $0xa8] sm:$0xff] }
  0x12   :  { %v156_v11 = vld [vmem:[%s861_s3 + $0xa0] sm:$0xff]  ;;  %v155_v12 = vld [vmem:[%s861_s3 + $0x98] sm:$0xff]  ;;  %v154_v13 = vld [vmem:[%s861_s3 + $0x90] sm:$0xff] }
  0x13   :  { %190 = vmatpush.msra.mxu3 %v163_v4  ;;  %170 = vmatpush.msra.mxu2 %v162_v5  ;;  %v74_v14 = vld [vmem:[#allocation2 + $0x10] sm:$0xff]  ;;  %v75_v15 = vld [vmem:[#allocation2 + $0x18] sm:$0xff]  ;;  %v72_v16 = vld [vmem:[#allocation2] sm:$0xff] }
  0x14   :  { %v153_v17 = vld [vmem:[%s861_s3 + $0x88] sm:$0xff]  ;;  %v152_v18 = vld [vmem:[%s861_s3 + $0x80] sm:$0xff]  ;;  %103 = vmatpush.msra.mxu0 %v74_v14  ;;  %126 = vmatpush.msra.mxu1 %v75_v15  ;;  %v151_v21 = vld [vmem:[%s861_s3 + $0x78] sm:$0xff] }
  0x15   :  { %191 = vmatpush.msra.mxu3 %v161_v6  ;;  %171 = vmatpush.msra.mxu2 %v160_v7  ;;  %v73_v19 = vld [vmem:[#allocation2 + $0x8] sm:$0xff]  ;;  %v688_v20 = vld [vmem:[%s858_s0] sm:$0xff]  ;;  %v150_v22 = vld [vmem:[%s861_s3 + $0x70] sm:$0xff] }
  0x16   :  { %104 = vmatpush.msra.mxu0 %v72_v16  ;;  %127 = vmatpush.msra.mxu1 %v73_v19  ;;  %v251_v23 = vld [vmem:[%s863_s5 + $0x78] sm:$0xff]  ;;  %v149_v25 = vld [vmem:[%s861_s3 + $0x68] sm:$0xff]  ;;  %v148_v26 = vld [vmem:[%s861_s3 + $0x60] sm:$0xff] }
  0x17   :  { %192 = vmatpush.msra.mxu3 %v159_v8  ;;  %172 = vmatpush.msra.mxu2 %v158_v9  ;;  %v267_v24 = vld [vmem:[%s863_s5 + $0xf8] sm:$0xff]  ;;  %v250_v27 = vld [vmem:[%s863_s5 + $0x70] sm:$0xff]  ;;  %v249_v31 = vld [vmem:[%s863_s5 + $0x68] sm:$0xff] }
  0x18   :  { %446 = vmatmul.msk.f32.vlgmr.msra.gmra.mxu0 %vm82_vm0, %v688_v20  ;;  %448 = vmatmul.msk.f32.vlgmr.msra.gmra.mxu1 %vm82_vm0, %v688_v20  ;;  %v266_v28 = vld [vmem:[%s863_s5 + $0xf0] sm:$0xff]  ;;  %v147_v29 = vld [vmem:[%s861_s3 + $0x58] sm:$0xff]  ;;  %v265_v32 = vld [vmem:[%s863_s5 + $0xe8] sm:$0xff] }
  0x19   :  { %193 = vmatpush.msra.mxu3 %v157_v10  ;;  %173 = vmatpush.msra.mxu2 %v156_v11  ;;  %v146_v30 = vld [vmem:[%s861_s3 + $0x50] sm:$0xff]  ;;  %v145_v33 = vld [vmem:[%s861_s3 + $0x48] sm:$0xff]  ;;  %v144_v34 = vld [vmem:[%s861_s3 + $0x40] sm:$0xff] }
  0x1a   :  { %268 = vmatpush.msrb.mxu0 %v251_v23  ;;  %291 = vmatpush.msrb.mxu1 %v267_v24  ;;  %v71_v35 = vld [vmem:[%s858_s0 + $0x8] sm:$0xff]  ;;  %v143_v36 = vld [vmem:[%s861_s3 + $0x38] sm:$0xff]  ;;  %v142_v37 = vld [vmem:[%s861_s3 + $0x30] sm:$0xff] }
  0x1b   :  { %194 = vmatpush.msra.mxu3 %v155_v12  ;;  %174 = vmatpush.msra.mxu2 %v154_v13  ;;  %v248_v38 = vld [vmem:[%s863_s5 + $0x60] sm:$0xff]  ;;  %v141_v40 = vld [vmem:[%s861_s3 + $0x28] sm:$0xff]  ;;  %v247_v42 = vld [vmem:[%s863_s5 + $0x58] sm:$0xff] }
  0x1c   :  { %269 = vmatpush.msrb.mxu0 %v250_v27  ;;  %292 = vmatpush.msrb.mxu1 %v266_v28  ;;  %v264_v39 = vld [vmem:[%s863_s5 + $0xe0] sm:$0xff]  ;;  %v263_v43 = vld [vmem:[%s863_s5 + $0xd8] sm:$0xff]  ;;  %v138_v45 = vld [vmem:[%s861_s3 + $0x10] sm:$0xff] }
  0x1d   :  { %195 = vmatpush.msra.mxu3 %v153_v17  ;;  %175 = vmatpush.msra.mxu2 %v152_v18  ;;  %v140_v41 = vld [vmem:[%s861_s3 + $0x20] sm:$0xff]  ;;  %v139_v44 = vld [vmem:[%s861_s3 + $0x18] sm:$0xff]  ;;  %v246_v46 = vld [vmem:[%s863_s5 + $0x50] sm:$0xff] }
  0x1e   :  { %270 = vmatpush.msrb.mxu0 %v249_v31  ;;  %293 = vmatpush.msrb.mxu1 %v265_v32  ;;  %v262_v47 = vld [vmem:[%s863_s5 + $0xd0] sm:$0xff]  ;;  %v137_v48 = vld [vmem:[%s861_s3 + $0x8] sm:$0xff]  ;;  %v136_v49 = vld [vmem:[%s861_s3] sm:$0xff] }
  0x1f   :  { %196 = vmatpush.msra.mxu3 %v151_v21  ;;  %176 = vmatpush.msra.mxu2 %v150_v22  ;;  %v135_v50 = vld [vmem:[%s859_s1] sm:$0x3]  ;;  %v245_v51 = vld [vmem:[%s863_s5 + $0x48] sm:$0xff]  ;;  %v243_v55 = vld [vmem:[%s863_s5 + $0x38] sm:$0xff] }
  0x20   :  { %447 = vmatmul.msk.f32.gmra.mxu0 %vm82_vm0, %v71_v35  ;;  %449 = vmatmul.msk.f32.gmra.mxu1 %vm82_vm0, %v71_v35  ;;  %v261_v52 = vld [vmem:[%s863_s5 + $0xc8] sm:$0xff]  ;;  %v244_v53 = vld [vmem:[%s863_s5 + $0x40] sm:$0xff]  ;;  %v259_v56 = vld [vmem:[%s863_s5 + $0xb8] sm:$0xff] }
  0x21   :  { %197 = vmatpush.msra.mxu3 %v149_v25  ;;  %177 = vmatpush.msra.mxu2 %v148_v26  ;;  %v260_v54 = vld [vmem:[%s863_s5 + $0xc0] sm:$0xff]  ;;  %v242_v57 = vld [vmem:[%s863_s5 + $0x30] sm:$0xff]  ;;  %v241_v59 = vld [vmem:[%s863_s5 + $0x28] sm:$0xff] }
  0x22   :  { %271 = vmatpush.msrb.mxu0 %v248_v38  ;;  %294 = vmatpush.msrb.mxu1 %v264_v39  ;;  %v258_v58 = vld [vmem:[%s863_s5 + $0xb0] sm:$0xff]  ;;  %v257_v60 = vld [vmem:[%s863_s5 + $0xa8] sm:$0xff]  ;;  %v240_v61 = vld [vmem:[%s863_s5 + $0x20] sm:$0xff] }
  0x23   :  { %198 = vmatpush.msra.mxu3 %v147_v29  ;;  %178 = vmatpush.msra.mxu2 %v146_v30  ;;  %v256_v62 = vld [vmem:[%s863_s5 + $0xa0] sm:$0xff]  ;;  %v239_v63 = vld [vmem:[%s863_s5 + $0x18] sm:$0xff]  ;;  %v238_v1 = vld [vmem:[%s863_s5 + $0x10] sm:$0xff] }
  0x24   :  { %272 = vmatpush.msrb.mxu0 %v247_v42  ;;  %295 = vmatpush.msrb.mxu1 %v263_v43  ;;  %v255_v0 = vld [vmem:[%s863_s5 + $0x98] sm:$0xff]  ;;  %v254_v2 = vld [vmem:[%s863_s5 + $0x90] sm:$0xff]  ;;  %v237_v3 = vld [vmem:[%s863_s5 + $0x8] sm:$0xff] }
  0x25   :  { %199 = vmatpush.msra.mxu3 %v145_v33  ;;  %179 = vmatpush.msra.mxu2 %v144_v34  ;;  %v253_v4 = vld [vmem:[%s863_s5 + $0x88] sm:$0xff]  ;;  %v236_v5 = vld [vmem:[%s863_s5] sm:$0xff] }
  0x26   :  { %273 = vmatpush.msrb.mxu0 %v246_v46  ;;  %296 = vmatpush.msrb.mxu1 %v262_v47  ;;  %v252_v6 = vld [vmem:[%s863_s5 + $0x80] sm:$0xff]  ;;  %s585_s5 = smov [#allocation8]  }
  0x27   :  { %200 = vmatpush.msra.mxu3 %v143_v36  ;;  %180 = vmatpush.msra.mxu2 %v142_v37  ;;  %v76_v9 = vld [vmem:[#allocation5] sm:$0x3]  ;;  %v314_v42 = vld [vmem:[#allocation7] sm:$0xff]  ;;  %s430_s4 = sshll.u32 %s585_s5, 4  ;;  %s431_s4 = int_to_ptr.vmem [resolvable:$true] %s430_s4 }
  0x28   :  { %274 = vmatpush.msrb.mxu0 %v245_v51  ;;  %297 = vmatpush.msrb.mxu1 %v261_v52  ;;  %v78_v10 = vperm.slane %v76_v9, 0  ;;  %v79_v11 = vperm.slane %v76_v9, 1 }
  0x29   :  { %201 = vmatpush.msra.mxu3 %v141_v40  ;;  %181 = vmatpush.msra.mxu2 %v140_v41 }
  0x2a   :  { %275 = vmatpush.msrb.mxu0 %v244_v53  ;;  %298 = vmatpush.msrb.mxu1 %v260_v54 }
  0x2b   :  { %202 = vmatpush.msra.mxu3 %v139_v44  ;;  %182 = vmatpush.msra.mxu2 %v138_v45 }
  0x2c   :  { %276 = vmatpush.msrb.mxu0 %v243_v55  ;;  %299 = vmatpush.msrb.mxu1 %v259_v56 }
  0x2d   :  { %203 = vmatpush.msra.mxu3 %v137_v48  ;;  %183 = vmatpush.msra.mxu2 %v136_v49 }
  0x2e   :  { %204 = vmatmul.f32.vlgmr.msra.gmra.mxu3 %v135_v50  ;;  %184 = vmatmul.f32.vlgmr.msra.gmra.mxu2 %v135_v50 }
  0x2f   :  { %358 = vmatpush.msrb.mxu2 %v688_v20  ;;  %381 = vmatpush.msrb.mxu3 %v71_v35 }
  0x30   :  { %277 = vmatpush.msrb.mxu0 %v242_v57  ;;  %300 = vmatpush.msrb.mxu1 %v258_v58 }
  0x32   :  { %278 = vmatpush.msrb.mxu0 %v241_v59  ;;  %301 = vmatpush.msrb.mxu1 %v257_v60 }
  0x34   :  { %279 = vmatpush.msrb.mxu0 %v240_v61  ;;  %302 = vmatpush.msrb.mxu1 %v256_v62 }
  0x36   :  { %280 = vmatpush.msrb.mxu0 %v239_v63  ;;  %303 = vmatpush.msrb.mxu1 %v255_v0 }
  0x38   :  { %281 = vmatpush.msrb.mxu0 %v238_v1  ;;  %304 = vmatpush.msrb.mxu1 %v254_v2 }
  0x3a   :  { %282 = vmatpush.msrb.mxu0 %v237_v3  ;;  %305 = vmatpush.msrb.mxu1 %v253_v4 }
  0x3c   :  { %283 = vmatpush.msrb.mxu0 %v236_v5  ;;  %306 = vmatpush.msrb.mxu1 %v252_v6 }
  0x95   :  { %v106_v7 = vpop.f32.mrf.mxu0  ;;  %v129_v8 = vpop.f32.mrf.mxu1 }
  0x96   :  { %v107_v15 = vadd.f32 %v106_v7, %v78_v10  ;;  %v130_v16 = vadd.f32 %v129_v8, %v79_v11 }
  0x9d   :  { %v109_v17 = vpop.f32.mrf.mxu0  ;;  %v132_v18 = vpop.f32.mrf.mxu1 }
  0x9e   :  { %v110_v24 = vadd.f32 %v109_v17, %v78_v10  ;;  %v133_v25 = vadd.f32 %v132_v18, %v79_v11 }
  0xb1   :  { %v205_v12 = vpop.f32.mrf.mxu3  ;;  %v185_v13 = vpop.f32.mrf.mxu2 }
  0xb2   :  { %v210_v14 = vrot.slane %v205_v12, 7 }
  0xb4   :  { %v212_v19 = vsel %vm211_vm1, %v185_v13, %v210_v14  ;;  %v214_v20 = vsel %vm213_vm2, %v185_v13, %v210_v14 }
  0xb5   :  { %v215_v21 = vrot.slane %v214_v20, 1  ;;  %v216_v22 = vperm.slane %v212_v19, 0  ;;  %v217_v23 = vperm.slane %v212_v19, 1 }
  0xb7   :  { %v218_v26 = vperm.slane %v215_v21, 0  ;;  %v219_v27 = vperm.slane %v215_v21, 1  ;;  %v224_v28 = vadd.f32 %v216_v22, %v107_v15  ;;  %v225_v29 = vadd.f32 %v217_v23, %v130_v16 }
  0xb9   :  { %v228_v30 = vmul.f32 0.2, %v224_v28  ;;  %v229_v31 = vmul.f32 0.2, %v225_v29  ;;  %v226_v32 = vadd.f32 %v218_v26, %v110_v24  ;;  %v227_v33 = vadd.f32 %v219_v27, %v133_v25 }
  0xbb   :  { %v232_v34 = vmax.f32 %v224_v28, %v228_v30  ;;  %v233_v35 = vmax.f32 %v225_v29, %v229_v31  ;;  %v230_v36 = vmul.f32 0.2, %v226_v32  ;;  %v231_v37 = vmul.f32 0.2, %v227_v33 }
  0xbd   :  { %284 = vmatmul.f32.vlgmr.msrb.gmra.mxu0 %v232_v34  ;;  %307 = vmatmul.f32.vlgmr.msrb.gmra.mxu1 %v233_v35  ;;  %v234_v38 = vmax.f32 %v226_v32, %v230_v36  ;;  %v235_v39 = vmax.f32 %v227_v33, %v231_v37 }
  0xc5   :  { %287 = vmatmul.f32.gmra.mxu0 %v234_v38  ;;  %310 = vmatmul.f32.gmra.mxu1 %v235_v39 }
 0x13a   :  { %v285_v40 = vpop.f32.mrf.mxu0  ;;  %v308_v41 = vpop.f32.mrf.mxu1 }
 0x13b   :  { %v309_v43 = vadd.f32 %v308_v41, %v285_v40 }
 0x13d   :  { %v315_v44 = vadd.f32 %v314_v42, %v309_v43 }
 0x13f   :  { %v318_v45 = vsel %vm317_vm3, %v315_v44, -inf }
 0x140   :  { %319 = vmax.xlane.f32.xlu0 %v318_v45 }
 0x142   :  { %v288_v46 = vpop.f32.mrf.mxu0  ;;  %v311_v47 = vpop.f32.mrf.mxu1 }
 0x143   :  { %v312_v48 = vadd.f32 %v311_v47, %v288_v46 }
 0x145   :  { %v316_v49 = vadd.f32 %v314_v42, %v312_v48 }
 0x147   :  { %v321_v50 = vsel %vm317_vm3, %v316_v49, -inf }
 0x148   :  { %322 = vmax.xlane.f32.xlu0 %v321_v50 }
 0x1b3   :  { %v320_v51 = vpop.xlane.xlu0 %319 }
 0x1b4   :  { %v324_v52 = vsub.f32 %v315_v44, %v320_v51 }
 0x1b6   :  { %v326_v53 = vmul.f32 1.442695, %v324_v52 }
 0x1b8   :  { %462 = vpow2.f32 %v326_v53 }
 0x1bb   :  { %v323_v54 = vpop.xlane.xlu0 %322 }
 0x1bc   :  { %v325_v55 = vsub.f32 %v316_v49, %v323_v54 }
 0x1be   :  { %v463_v56 = vpop.eup %462  ;;  %v328_v57 = vmul.f32 1.442695, %v325_v55 }
 0x1bf   :  { %v330_v58 = vsel %vm317_vm3, %v463_v56, 0.0 }
 0x1c0   :  { %464 = vpow2.f32 %v328_v57  ;;  %331 = vadd.xlane.f32.xlu1 %v330_v58 }
 0x1c6   :  { %v465_v59 = vpop.eup %464 }
 0x1c7   :  { %v333_v60 = vsel %vm317_vm3, %v465_v59, 0.0 }
 0x1c8   :  { %334 = vadd.xlane.f32.xlu1 %v333_v60 }
 0x233   :  { %v332_v61 = vpop.xlane.xlu1 %331 }
 0x234   :  { %466 = vrcp.f32 %v332_v61 }
 0x23a   :  { %v467_v62 = vpop.eup %466 }
 0x23b   :  { %v335_v63 = vpop.xlane.xlu1 %334  ;;  %v338_v0 = vmul.f32 %v467_v62, %v463_v56 }
 0x23c   :  { %468 = vrcp.f32 %v335_v63 }
 0x23d   :  { %450 = vmatmul.msk.f32.vlgmr.msrb.gmra.mxu2 %vm317_vm3, %v338_v0 }
 0x242   :  { %v469_v1 = vpop.eup %468 }
 0x243   :  { %v339_v2 = vmul.f32 %v469_v1, %v465_v59 }
 0x245   :  { %451 = vmatmul.msk.f32.vlgmr.msrb.gmra.mxu3 %vm317_vm3, %v339_v2 }
 0x2c0   :  { %v360_v3 = vpop.f32.mrf.mxu2 }
 0x2c1   :  { %v452_v4 = vmul.f32 -1.442695, %v360_v3 }
 0x2c3   :  { %470 = vpow2.f32 %v452_v4 }
 0x2c8   :  { %v383_v5 = vpop.f32.mrf.mxu3 }
 0x2c9   :  { %v471_v6 = vpop.eup %470  ;;  %v453_v7 = vmul.f32 -1.442695, %v383_v5 }
 0x2ca   :  { %v392_v8 = vadd.f32 1.0, %v471_v6 }
 0x2cb   :  { %472 = vpow2.f32 %v453_v7 }
 0x2cc   :  { %474 = vrcp.f32 %v392_v8  ;;  %v405_v14 = vand.u32 2147483648, %v392_v8  ;;  %v403_v16 = vand.u32 2147483647, %v392_v8  ;;  %vm399_vm5 = vweird.f32 %v392_v8 }
 0x2ce   :  { %v406_v19 = vor.u32 1.1754944e-38, %v405_v14  ;;  %vm404_vm7 = vcmp.eq.f32.partialorder %v403_v16, 8.507059e+37 }
 0x2d1   :  { %v473_v9 = vpop.eup %472 }
 0x2d2   :  { %v475_v10 = vpop.eup %474  ;;  %v393_v11 = vadd.f32 1.0, %v473_v9 }
 0x2d3   :  { %v395_v12 = vmul.f32 %v475_v10, %v392_v8  ;;  %vm400_vm4 = vweird.f32 %v475_v10 }
 0x2d4   :  { %476 = vrcp.f32 %v393_v11  ;;  %vm401_vm6 = vmor %vm399_vm5, %vm400_vm4  ;;  %v420_v24 = vand.u32 2147483648, %v393_v11  ;;  %v418_v26 = vand.u32 2147483647, %v393_v11  ;;  %vm414_vm9 = vweird.f32 %v393_v11 }
 0x2d5   :  { %v396_v13 = vsub.f32 1.0, %v395_v12 }
 0x2d6   :  { %v421_v28 = vor.u32 1.1754944e-38, %v420_v24  ;;  %vm419_vm11 = vcmp.eq.f32.partialorder %v418_v26, 8.507059e+37 }
 0x2d7   :  { %v397_v15 = vmul.f32 %v475_v10, %v396_v13 }
 0x2d9   :  { %v398_v17 = vadd.f32 %v475_v10, %v397_v15 }
 0x2da   :  { %v477_v18 = vpop.eup %476 }
 0x2db   :  { %v410_v20 = vmul.f32 %v477_v18, %v393_v11  ;;  %v402_v21 = vsel %vm401_vm6, %v475_v10, %v398_v17  ;;  %vm415_vm8 = vweird.f32 %v477_v18 }
 0x2dc   :  { %v407_v22 = vsel %vm404_vm7, %v406_v19, %v402_v21  ;;  %vm416_vm10 = vmor %vm414_vm9, %vm415_vm8 }
 0x2dd   :  { %v411_v23 = vsub.f32 1.0, %v410_v20  ;;  %424 = vst.msk [vmem:[#allocation8] sm:$0xff] %vm82_vm0, %v407_v22 }
 0x2df   :  { %v412_v25 = vmul.f32 %v477_v18, %v411_v23 }
 0x2e1   :  { %v413_v27 = vadd.f32 %v477_v18, %v412_v25 }
 0x2e3   :  { %v417_v29 = vsel %vm416_vm10, %v477_v18, %v413_v27 }
 0x2e4   :  { %v422_v30 = vsel %vm419_vm11, %v421_v28, %v417_v29 }
 0x2e5   :  { %425 = vst.msk [vmem:[#allocation8 + $0x8] sm:$0xff] %vm82_vm0, %v422_v30 }
 0x2e6   :  { %438 = dma.vmem_to_hbm [thread:$0]  %s431_s4, 256, %s433_s2, [#allocation4], %s586_s17, %s586_s17, %s587_s18  }
 0x2e7   :  { %578 = dma.done.wait [#allocation4], 256  }
 0x2e8   :  { %579 = vsyncadd [#allocation4], 4294967040 }
 0x2e9   :  { %443 = vsyncpa [#allocation3], 1 }
 0x2ea   :  { %444 = vsyncpa [#allocation6], 1 }
 0x2eb   :  { %445 = vsyncpa [#allocation4], 1 }

</bundles_post_ra>
